<compile_context>
chip_gen: v7x
topology: tpu7x:2x2x1
jax: 0.10.0
libtpu: 0.0.40
codegen_flags: <defaults>
</compile_context>

<pallas_src>
import functools

import jax
import jax.numpy as jnp
from jax.experimental import pallas as pl
from jax.experimental.pallas import tpu as pltpu

KSIZE = 5
PAD = (KSIZE - 1) // 2

_DEFAULT_VMEM_CAP = 128 * 1024 * 1024


def _tpu_vmem_capacity_bytes():
    """Physical per-core VMEM (128 MiB on v5e/v6e, 64 MiB on v7x)."""
    try:
        info = pltpu.get_tpu_info()
        return int(getattr(info, "vmem_capacity_bytes", _DEFAULT_VMEM_CAP))
    except Exception:
        return _DEFAULT_VMEM_CAP


def _conv1d_rows(v, w_ref):
    """Shared Conv1d(1,1,KSIZE,padding=PAD,bias=False) (cross-correlation,
    zero padding, matching PyTorch) applied to every row of the (R, L) tile."""
    R, L = v.shape
    z = jnp.zeros((R, PAD), v.dtype)
    vp = jnp.concatenate([z, v, z], axis=1)            # (R, L + 2*PAD)
    acc = jnp.zeros((R, L), v.dtype)
    for k in range(KSIZE):                             # static unroll, K = 5
        acc = acc + w_ref[k] * vp[:, k:k + L]
    return acc


def _spatial_atten3_kernel(w_ref, x_ref, o_ref, *, C, H, W):
    # w_ref: SMEM (KSIZE,) conv weight
    # x_ref: VMEM (Bt, C*H*W) channel-flattened lane-dense input tile
    # o_ref: VMEM (Bt, C*H*W) output tile
    Bt, _ = x_ref.shape
    HW = H * W
    inv_c = jnp.float32(1.0 / C)

    # Channel mean as a sum of C lane-aligned slices: no (C,HW) sublane
    # padding, no relayout, and the full tile is never held live.
    # (Static unroll over C; fine for small/moderate C.)
    xm = x_ref[:, 0:HW].astype(jnp.float32)
    for c in range(1, C):
        xm = xm + x_ref[:, c * HW:(c + 1) * HW].astype(jnp.float32)
    xm = xm * inv_c                                    # (Bt, HW)

    # Spatial means over W (lane reduce) and H (sublane reduce) on the small
    # (Bt, H, W) relayout of the channel mean only.
    xm3 = xm.reshape(Bt, H, W)
    hv = jnp.mean(xm3, axis=2)                         # (Bt, H)
    wv = jnp.mean(xm3, axis=1)                         # (Bt, W)

    # One shared 5-tap conv over the stacked [hv; wv] rows (H == W == L).
    vc = _conv1d_rows(jnp.concatenate([hv, wv], axis=0), w_ref)   # (2*Bt, L)
    hc = vc[:Bt]                                       # (Bt, H)
    wc = vc[Bt:]                                       # (Bt, W)

    # sigmoid(outer product) gate, built lane-dense as (Bt, H*W).
    gate = jax.nn.sigmoid(hc[:, :, None] * wc[:, None, :]).reshape(Bt, HW)

    # Apply the gate per channel slice: each load/store is a full-lane-width
    # (HW multiple of 128) unmasked access and live ranges stay short.
    for c in range(C):
        sl = slice(c * HW, (c + 1) * HW)
        o_ref[:, sl] = (gate * x_ref[:, sl].astype(jnp.float32)).astype(o_ref.dtype)


def _choose_tiling(B, bytes_per_batch, block_budget, want_two_steps):
    """Pick (batch_tile, padded_B): the largest sublane-dense (multiple-of-8)
    batch tile under the per-block VMEM budget, decoupled from B's divisors.
    On 2-TC (v7x-like) parts keep an even number of grid steps so the
    'parallel' split stays balanced."""
    max_bt = max(1, block_budget // max(1, bytes_per_batch))
    if B <= 8 or (max_bt >= B and not want_two_steps):
        # Single step; block first dim == full array dim, so no multiple-of-8
        # requirement and no padding.
        return B, B
    min_steps = 2 if want_two_steps else 1
    steps = max(min_steps, -(-B // max_bt))            # cdiv
    if want_two_steps and steps % 2:
        steps += 1                                     # keep both TCs fed
    if steps <= 1:
        return B, B
    bt = -(-B // steps)                                # cdiv
    bt = ((bt + 7) // 8) * 8                           # sublane-dense batch tile
    b_pad = ((B + bt - 1) // bt) * bt
    return bt, b_pad


def spatial_atten3(x, conv_weight, *, size=None):
    """x: (B, C, H, W); conv_weight: (KSIZE,) float32."""
    B, C, H, W = x.shape
    if size is None:
        size = H
    # AdaptiveAvgPool2d((size,1)) / ((1,size)) == plain means over W / H only
    # when H == W == size; the kernel hard-codes that equivalence.
    # TODO(synk): implement true adaptive-pool binning for H != size / W != size.
    assert H == W == size, "spatial_atten3 kernel requires H == W == size"

    HW = H * W
    CHW = C * HW
    itemsize = x.dtype.itemsize
    bytes_per_batch = CHW * itemsize

    x_flat = x.reshape(B, CHW)                         # channel-flattened lane-dense layout
    w1 = conv_weight.reshape(KSIZE).astype(jnp.float32)

    # Generation-aware VMEM sizing (128 MiB on v5e/v6e, 64 MiB on v7x).
    vmem_cap = _tpu_vmem_capacity_bytes()
    base_limit = (vmem_cap * 3) // 4                   # 96 MiB / 48 MiB
    block_budget = base_limit // 6                     # 2 arrays x 2 buffers + temporaries
    want_two_steps = vmem_cap < 100 * 1024 * 1024      # v7x-like: 2 TCs share the grid

    bt, b_pad = _choose_tiling(B, bytes_per_batch, block_budget, want_two_steps)
    if b_pad != B:
        x_flat = jnp.pad(x_flat, ((0, b_pad - B), (0, 0)))
    grid = (b_pad // bt,)

    # Guarantee the limit covers the chosen blocks (extreme C*H*W shapes).
    needed = 5 * bt * bytes_per_batch
    vmem_limit = int(min(vmem_cap, max(base_limit, needed)))

    kernel = functools.partial(_spatial_atten3_kernel, C=C, H=H, W=W)
    cost = pl.CostEstimate(
        flops=int(3 * b_pad * CHW + 2 * KSIZE * b_pad * (H + W)),
        transcendentals=int(b_pad * HW),
        bytes_accessed=int(2 * b_pad * CHW * itemsize),
    )

    out_flat = pl.pallas_call(
        kernel,
        out_shape=jax.ShapeDtypeStruct((b_pad, CHW), x.dtype),
        grid=grid,
        in_specs=[
            pl.BlockSpec(memory_space=pltpu.MemorySpace.SMEM),   # conv weight
            pl.BlockSpec((bt, CHW), lambda i: (i, 0)),           # x tile
        ],
        out_specs=pl.BlockSpec((bt, CHW), lambda i: (i, 0)),
        compiler_params=pltpu.CompilerParams(
            dimension_semantics=("parallel",),
            vmem_limit_bytes=vmem_limit,
        ),
        cost_estimate=cost,
    )(w1, x_flat)
    return out_flat[:B].reshape(B, C, H, W)


def reference(x, w):
    """Pure-JAX reimplementation of the PyTorch forward (for verification)."""
    avg_h = jnp.mean(x, axis=3, keepdims=True)         # GAP_H  (B,C,H,1)
    avg_w = jnp.mean(x, axis=2, keepdims=True)         # GAP_W  (B,C,1,W)
    h = jnp.mean(avg_h, axis=1, keepdims=True)         # (B,1,H,1)
    wv = jnp.mean(avg_w, axis=1, keepdims=True)        # (B,1,1,W)
    hs = h[..., 0]                                     # (B,1,H)
    ws = wv[:, :, 0, :]                                # (B,1,W)

    def conv(v):
        L = v.shape[2]
        vp = jnp.pad(v, ((0, 0), (0, 0), (PAD, PAD)))
        return sum(w[k] * vp[:, :, k:k + L] for k in range(KSIZE))

    hc = conv(hs)[..., None]                           # (B,1,H,1)
    wc = conv(ws)[:, :, None, :]                       # (B,1,1,W)
    gate = jax.nn.sigmoid(hc * wc)
    return gate * x


if __name__ == "__main__":
    key = jax.random.PRNGKey(0)
    kx, kw = jax.random.split(key)

    B, C, H, W = 2, 4, 16, 16                          # H == W == size (=16)
    x = jax.random.normal(kx, (B, C, H, W), dtype=jnp.float32)

    # Deterministic Conv1d(1,1,5,bias=False) weight, PyTorch-style uniform init
    bound = 1.0 / (1 * KSIZE) ** 0.5
    conv_w = jax.random.uniform(kw, (KSIZE,), jnp.float32, -bound, bound)

    out = jax.block_until_ready(spatial_atten3(x, conv_w))

    ref = reference(x, conv_w)
    assert out.shape == x.shape and out.dtype == x.dtype
    assert jnp.allclose(out, ref, atol=1e-5, rtol=1e-5), "mismatch vs JAX reference"

    print("KERNEL_OK")
</pallas_src>

<mosaic_0001>
module attributes {stable_mosaic.version = 11 : i64} {
  func.func @_spatial_atten3_kernel(%arg0: i32, %arg1: memref<5xf32, #tpu.memory_space<smem>>, %arg2: memref<2x1024xf32, #tpu.memory_space<vmem>>, %arg3: memref<2x1024xf32, #tpu.memory_space<vmem>>) attributes {dimension_semantics = [#tpu.dimension_semantics<parallel>], iteration_bounds = array<i64: 1>, scalar_prefetch = 0 : i64, scratch_operands = 0 : i64, tpu.core_type = #tpu.core_type<tc>, window_params = [{transform_indices = @transform_0, window_bounds = array<i64: 5>}, {transform_indices = @transform_1, window_bounds = array<i64: 2, 1024>}, {transform_indices = @transform_2, window_bounds = array<i64: 2, 1024>}]} {
    %c0 = arith.constant 0 : index
    %c0_0 = arith.constant 0 : index
    %0 = vector.load %arg2[%c0, %c0_0] : memref<2x1024xf32, #tpu.memory_space<vmem>>, vector<2x256xf32>
    %c0_1 = arith.constant 0 : index
    %c256 = arith.constant 256 : index
    %1 = vector.load %arg2[%c0_1, %c256] : memref<2x1024xf32, #tpu.memory_space<vmem>>, vector<2x256xf32>
    %2 = arith.addf %0, %1 : vector<2x256xf32>
    %c0_2 = arith.constant 0 : index
    %c512 = arith.constant 512 : index
    %3 = vector.load %arg2[%c0_2, %c512] : memref<2x1024xf32, #tpu.memory_space<vmem>>, vector<2x256xf32>
    %4 = arith.addf %2, %3 : vector<2x256xf32>
    %c0_3 = arith.constant 0 : index
    %c768 = arith.constant 768 : index
    %5 = vector.load %arg2[%c0_3, %c768] : memref<2x1024xf32, #tpu.memory_space<vmem>>, vector<2x256xf32>
    %6 = arith.addf %4, %5 : vector<2x256xf32>
    %cst = arith.constant 2.500000e-01 : f32
    %7 = vector.broadcast %cst : f32 to vector<2x256xf32>
    %8 = arith.mulf %6, %7 : vector<2x256xf32>
    %9 = vector.shape_cast %8 : vector<2x256xf32> to vector<2x16x16xf32>
    %cst_4 = arith.constant dense<0.000000e+00> : vector<2x16xf32>
    %10 = vector.multi_reduction <add>, %9, %cst_4 [2] : vector<2x16x16xf32> to vector<2x16xf32>
    %cst_5 = arith.constant 1.600000e+01 : f32
    %11 = vector.broadcast %cst_5 : f32 to vector<2x16xf32>
    %12 = arith.divf %10, %11 : vector<2x16xf32>
    %cst_6 = arith.constant dense<0.000000e+00> : vector<2x16xf32>
    %13 = vector.multi_reduction <add>, %9, %cst_6 [1] : vector<2x16x16xf32> to vector<2x16xf32>
    %cst_7 = arith.constant 1.600000e+01 : f32
    %14 = vector.broadcast %cst_7 : f32 to vector<2x16xf32>
    %15 = arith.divf %13, %14 : vector<2x16xf32>
    %16 = tpu.concatenate %12, %15 in 0 : vector<2x16xf32>, vector<2x16xf32> -> vector<4x16xf32>
    %cst_8 = arith.constant 0.000000e+00 : f32
    %17 = vector.broadcast %cst_8 : f32 to vector<4x2xf32>
    %18 = tpu.concatenate %17, %16, %17 in 1 : vector<4x2xf32>, vector<4x16xf32>, vector<4x2xf32> -> vector<4x20xf32>
    %cst_9 = arith.constant 0.000000e+00 : f32
    %19 = vector.broadcast %cst_9 : f32 to vector<4x16xf32>
    %c0_10 = arith.constant 0 : index
    %20 = memref.load %arg1[%c0_10] : memref<5xf32, #tpu.memory_space<smem>>
    %21 = vector.extract_strided_slice %18 {offsets = [0, 0], sizes = [4, 16], strides = [1, 1]} : vector<4x20xf32> to vector<4x16xf32>
    %22 = vector.broadcast %20 : f32 to vector<4x16xf32>
    %23 = arith.mulf %22, %21 : vector<4x16xf32>
    %24 = arith.addf %19, %23 : vector<4x16xf32>
    %c1 = arith.constant 1 : index
    %25 = memref.load %arg1[%c1] : memref<5xf32, #tpu.memory_space<smem>>
    %26 = vector.extract_strided_slice %18 {offsets = [0, 1], sizes = [4, 16], strides = [1, 1]} : vector<4x20xf32> to vector<4x16xf32>
    %27 = vector.broadcast %25 : f32 to vector<4x16xf32>
    %28 = arith.mulf %27, %26 : vector<4x16xf32>
    %29 = arith.addf %24, %28 : vector<4x16xf32>
    %c2 = arith.constant 2 : index
    %30 = memref.load %arg1[%c2] : memref<5xf32, #tpu.memory_space<smem>>
    %31 = vector.extract_strided_slice %18 {offsets = [0, 2], sizes = [4, 16], strides = [1, 1]} : vector<4x20xf32> to vector<4x16xf32>
    %32 = vector.broadcast %30 : f32 to vector<4x16xf32>
    %33 = arith.mulf %32, %31 : vector<4x16xf32>
    %34 = arith.addf %29, %33 : vector<4x16xf32>
    %c3 = arith.constant 3 : index
    %35 = memref.load %arg1[%c3] : memref<5xf32, #tpu.memory_space<smem>>
    %36 = vector.extract_strided_slice %18 {offsets = [0, 3], sizes = [4, 16], strides = [1, 1]} : vector<4x20xf32> to vector<4x16xf32>
    %37 = vector.broadcast %35 : f32 to vector<4x16xf32>
    %38 = arith.mulf %37, %36 : vector<4x16xf32>
    %39 = arith.addf %34, %38 : vector<4x16xf32>
    %c4 = arith.constant 4 : index
    %40 = memref.load %arg1[%c4] : memref<5xf32, #tpu.memory_space<smem>>
    %41 = vector.extract_strided_slice %18 {offsets = [0, 4], sizes = [4, 16], strides = [1, 1]} : vector<4x20xf32> to vector<4x16xf32>
    %42 = vector.broadcast %40 : f32 to vector<4x16xf32>
    %43 = arith.mulf %42, %41 : vector<4x16xf32>
    %44 = arith.addf %39, %43 : vector<4x16xf32>
    %45 = vector.extract_strided_slice %44 {offsets = [0, 0], sizes = [2, 16], strides = [1, 1]} : vector<4x16xf32> to vector<2x16xf32>
    %46 = vector.extract_strided_slice %44 {offsets = [2, 0], sizes = [2, 16], strides = [1, 1]} : vector<4x16xf32> to vector<2x16xf32>
    %47 = vector.shape_cast %45 : vector<2x16xf32> to vector<2x16x1xf32>
    %48 = vector.shape_cast %46 : vector<2x16xf32> to vector<2x1x16xf32>
    %49 = vector.broadcast %47 : vector<2x16x1xf32> to vector<2x16x16xf32>
    %50 = vector.broadcast %48 : vector<2x1x16xf32> to vector<2x16x16xf32>
    %51 = arith.mulf %49, %50 : vector<2x16x16xf32>
    %52 = arith.negf %51 : vector<2x16x16xf32>
    %53 = math.exp %52 : vector<2x16x16xf32>
    %cst_11 = arith.constant 1.000000e+00 : f32
    %54 = vector.broadcast %cst_11 : f32 to vector<2x16x16xf32>
    %55 = arith.addf %54, %53 : vector<2x16x16xf32>
    %56 = arith.divf %54, %55 : vector<2x16x16xf32>
    %57 = vector.shape_cast %56 : vector<2x16x16xf32> to vector<2x256xf32>
    %c0_12 = arith.constant 0 : index
    %c0_13 = arith.constant 0 : index
    %58 = vector.load %arg2[%c0_12, %c0_13] : memref<2x1024xf32, #tpu.memory_space<vmem>>, vector<2x256xf32>
    %59 = arith.mulf %57, %58 : vector<2x256xf32>
    %c0_14 = arith.constant 0 : index
    %c0_15 = arith.constant 0 : index
    %60 = vector.load %arg3[%c0_14, %c0_15] : memref<2x1024xf32, #tpu.memory_space<vmem>>, vector<2x256xf32>
    tpu.vector_store %arg3[%c0_14, %c0_15], %59 {strides = array<i32>} : memref<2x1024xf32, #tpu.memory_space<vmem>>, vector<2x256xf32>,
    %c0_16 = arith.constant 0 : index
    %c256_17 = arith.constant 256 : index
    %61 = vector.load %arg2[%c0_16, %c256_17] : memref<2x1024xf32, #tpu.memory_space<vmem>>, vector<2x256xf32>
    %62 = arith.mulf %57, %61 : vector<2x256xf32>
    %c0_18 = arith.constant 0 : index
    %c256_19 = arith.constant 256 : index
    %63 = vector.load %arg3[%c0_18, %c256_19] : memref<2x1024xf32, #tpu.memory_space<vmem>>, vector<2x256xf32>
    tpu.vector_store %arg3[%c0_18, %c256_19], %62 {strides = array<i32>} : memref<2x1024xf32, #tpu.memory_space<vmem>>, vector<2x256xf32>,
    %c0_20 = arith.constant 0 : index
    %c512_21 = arith.constant 512 : index
    %64 = vector.load %arg2[%c0_20, %c512_21] : memref<2x1024xf32, #tpu.memory_space<vmem>>, vector<2x256xf32>
    %65 = arith.mulf %57, %64 : vector<2x256xf32>
    %c0_22 = arith.constant 0 : index
    %c512_23 = arith.constant 512 : index
    %66 = vector.load %arg3[%c0_22, %c512_23] : memref<2x1024xf32, #tpu.memory_space<vmem>>, vector<2x256xf32>
    tpu.vector_store %arg3[%c0_22, %c512_23], %65 {strides = array<i32>} : memref<2x1024xf32, #tpu.memory_space<vmem>>, vector<2x256xf32>,
    %c0_24 = arith.constant 0 : index
    %c768_25 = arith.constant 768 : index
    %67 = vector.load %arg2[%c0_24, %c768_25] : memref<2x1024xf32, #tpu.memory_space<vmem>>, vector<2x256xf32>
    %68 = arith.mulf %57, %67 : vector<2x256xf32>
    %c0_26 = arith.constant 0 : index
    %c768_27 = arith.constant 768 : index
    %69 = vector.load %arg3[%c0_26, %c768_27] : memref<2x1024xf32, #tpu.memory_space<vmem>>, vector<2x256xf32>
    tpu.vector_store %arg3[%c0_26, %c768_27], %68 {strides = array<i32>} : memref<2x1024xf32, #tpu.memory_space<vmem>>, vector<2x256xf32>,
    return
  }
  func.func @transform_0(%arg0: i32) -> i32 {
    %c0_i32 = arith.constant 0 : i32
    %c0_i32_0 = arith.constant 0 : i32
    return %c0_i32 : i32
  }
  func.func @transform_1(%arg0: i32) -> (i32, i32) {
    %c0_i32 = arith.constant 0 : i32
    %c0_i32_0 = arith.constant 0 : i32
    return %arg0, %c0_i32 : i32, i32
  }
  func.func @transform_2(%arg0: i32) -> (i32, i32) {
    %c0_i32 = arith.constant 0 : i32
    %c0_i32_0 = arith.constant 0 : i32
    return %arg0, %c0_i32 : i32, i32
  }
}

</mosaic_0001>

<bundles_post_ra>
// kernel: tpu_custom_call.1
= control target key start
LH: loop header
LB: loop body
LE: loop exit
PB: predicated region body
PF: predicated region fallthrough
CT: control target
= control target key end

     0   :  { %7 = vsyncpa [#allocation5], 0  ;;  %s1030_s0 = inlined_call_operand.hbm [shape: f32[5], index: 0, kind: input, shape index: {}]   ;;  %s1031_s1 = inlined_call_operand.hbm [shape: f32[2,1024], index: 1, kind: input, shape index: {}]   ;;  %s1032_s2 = inlined_call_operand.hbm [shape: f32[2,1024], index: 2, kind: output, shape index: {}]  }
   0x1   :  { %8 = vsyncpa [#allocation3], 0 }
   0x2   :  { %9 = vsyncpa [#allocation4], 0  ;;  %s821_s11 = scalar_lea.hbm %s1030_s0, 16 }
   0x3   :  { %p822_p0 = scmp.ne.s32.totalorder %s1030_s0, %s821_s11  ;;  %p825_p1 = scmp.lt.u32.totalorder %s821_s11, %s1030_s0 }
   0x5   :  { %p827_p2 = pnand %p825_p1, %p822_p0 }
   0x7   :  { %830 = shalt.err (!%p827_p2)
}
   0x8   :  { %s881_s16 = smov [#allocation2]   ;;  %s882_s19 = smov [#allocation6]  }
   0x9   :  { %17 = dma.hbm_to_smem %s1030_s0, 16, %s881_s16, [#allocation5]  }
   0xa   :  { %s24_s20 = sshll.u32 %s882_s19, 4  ;;  %s831_s23 = scalar_lea.hbm %s1031_s1, 256  ;;  %s25_s20 = int_to_ptr.vmem [resolvable:$true] %s24_s20 }
   0xb   :  { %p832_p3 = scmp.ne.s32.totalorder %s1031_s1, %s831_s23  ;;  %p835_p4 = scmp.lt.u32.totalorder %s831_s23, %s1031_s1 }
   0xd   :  { %p837_p5 = pnand %p835_p4, %p832_p3 }
   0xf   :  { %840 = shalt.err (!%p837_p5)
}
  0x10   :  { %s841_s28 = scalar_lea.vmem %s25_s20, 256  ;;  %p846_p7 = scmp.lt.s32.totalorder %s25_s20, %s25_s20 }
  0x11   :  { %p842_p6 = scmp.ne.s32.totalorder %s25_s20, %s841_s28  ;;  %p847_p8 = scmp.lt.s32.totalorder %s841_s28, %s841_s28 }
  0x13   :  { %p848_p9 = por %p847_p8, %p846_p7 }
  0x15   :  { %p849_p10 = pnand %p848_p9, %p842_p6 }
  0x17   :  { %852 = shalt.err (!%p849_p10)
}
  0x18   :  { %27 = dma.hbm_to_vmem [thread:$0]  %s1031_s1, 256, %s25_s20, [#allocation3]  }
  0x19   :  { %875 = dma.done.wait [#allocation5], 16  }
  0x1a   :  { %876 = vsyncadd [#allocation5], 4294967280 }
  0x1b   :  { %877 = dma.done.wait [#allocation3], 256  }
  0x1c   :  { %878 = vsyncadd [#allocation3], 4294967040 }
  0x1d   :  { %34 = sfence }
  0x1e   :  { %v939_v0 = vld [vmem:[#allocation6] sm:$0xf]  ;;  %v36_v1 = vld [vmem:[#allocation6 + $0x4] sm:$0xf]  ;;  %v38_v2 = vld [vmem:[#allocation6 + $0x8] sm:$0xf]  ;;  %v85_v10 = vlaneseq }
  0x1f   :  { %v37_v3 = vadd.f32 %v36_v1, %v939_v0  ;;  %v40_v4 = vld [vmem:[#allocation6 + $0xc] sm:$0xf]  ;;  %s883_s30 = smov 112   ;;  %s884_s3 = smov 80   ;;  %v890_v8 = vmov 1934713408  }
  0x20   :  { %s885_s1 = smov 96   ;;  %s886_s4 = smov 64   ;;  %v83_v9 = vunpack.c.l.s4 %v890_v8  ;;  %v950_v14 = vshrl.u32 %v85_v10, 7  ;;  %v891_v22 = vmov 1983009808   ;;  %vm241_vm0 = vcmask 130048  }
  0x21   :  { %v39_v5 = vadd.f32 %v38_v2, %v37_v3  ;;  %s887_s5 = smov 48   ;;  %s888_s6 = smov 32   ;;  %v172_v23 = vunpack.c.l.s4 %v891_v22  ;;  %vm306_vm1 = vcmask 1043459   ;;  %vm290_vm2 = vcmask 130112  }
  0x22   :  { %s889_s7 = smov 16   ;;  %v84_v13 = vunpack.c.0.s8 %v83_v9  ;;  %vm301_vm3 = vcmask 1041409   ;;  %vm309_vm4 = vcmask 1041408   ;;  %s892_s8 = smov 2   ;;  %vm315_vm5 = vcmask 15360  }
  0x23   :  { %v41_v6 = vadd.f32 %v40_v4, %v39_v5  ;;  %v173_v33 = vunpack.c.0.s8 %v172_v23  ;;  %s773_s9 = sld [smem:[#allocation2 + $0x3]]  ;;  %s771_s10 = sld [smem:[#allocation2 + $0x1]]  ;;  %vm317_vm6 = vcmask 146432   ;;  %vm629_vm7 = vcmask 261120  }
  0x24   :  { %v953_v24 = vsub.s32 %v84_v13, %v950_v14  ;;  %s772_s11 = sld [smem:[#allocation2 + $0x2]]  ;;  %s774_s12 = sld [smem:[#allocation2 + $0x4]]  ;;  %vm631_vm8 = vcmask 392192   ;;  %vm633_vm9 = vcmask 523264   ;;  %vm635_vm10 = vcmask 654336  }
  0x25   :  { %v42_v7 = vmul.f32 0.25, %v41_v6  ;;  %v960_v45 = vsub.s32 %v173_v33, %v950_v14  ;;  %s893_s13 = smov 125   ;;  %s894_s14 = smov 127   ;;  %vm637_vm11 = vcmask 785408   ;;  %vm639_vm12 = vcmask 916480  }
  0x26   :  { %s895_s15 = smov 126   ;;  %s896_s16 = smov 124  }
  0x27   :  { %46 = vrot.lane.b32.xlu0 %v42_v7, %s883_s30  ;;  %54 = vrot.lane.b32.xlu1 %v42_v7, %s884_s3  ;;  %v44_v19 = vrot.slane %v42_v7, 2  ;;  %s319_s17 = sld [smem:[#allocation2]]  ;;  %s899_s18 = smov [#allocation7]  }
  0x28   :  { %s757_s19 = sshll.u32 %s899_s18, 4  ;;  %s758_s19 = int_to_ptr.vmem [resolvable:$true] %s757_s19 }
  0x29   :  { %s853_s20 = scalar_lea.vmem %s758_s19, 256  ;;  %p858_p12 = scmp.lt.s32.totalorder %s758_s19, %s758_s19 }
  0x2a   :  { %p854_p11 = scmp.ne.s32.totalorder %s758_s19, %s853_s20  ;;  %p859_p13 = scmp.lt.s32.totalorder %s853_s20, %s853_s20 }
  0x2b   :  { %50 = vrot.lane.b32.xlu0 %v42_v7, %s885_s1  ;;  %58 = vrot.lane.b32.xlu1 %v42_v7, %s886_s4 }
  0x2c   :  { %p860_p0 = por %p859_p13, %p858_p12 }
  0x2e   :  { %p861_p1 = pnand %p860_p0, %p854_p11 }
  0x2f   :  { %62 = vrot.lane.b32.xlu0 %v42_v7, %s887_s5  ;;  %66 = vrot.lane.b32.xlu1 %v42_v7, %s888_s6 }
  0x33   :  { %70 = vrot.lane.b32.xlu0 %v42_v7, %s889_s7 }
  0x99   :  { %v47_v11 = vpop.permute.xlu0 %46  ;;  %v55_v12 = vpop.permute.xlu1 %54 }
  0x9a   :  { %v56_v15 = vrot.slane %v55_v12, 2  ;;  %v48_v20 = vrot.slane %v47_v11, 2  ;;  %v81_v25 = vcombine.low %v42_v7, %v47_v11 }
  0x9c   :  { %v117_v31 = vcombine.low %v44_v19, %v48_v20  ;;  %v88_v36 = vrot.slane %v81_v25, %v953_v24 }
  0x9d   :  { %v51_v16 = vpop.permute.xlu0 %50  ;;  %v59_v17 = vpop.permute.xlu1 %58 }
  0x9e   :  { %v52_v18 = vrot.slane %v51_v16, 2  ;;  %v90_v21 = vcombine.low %v51_v16, %v55_v12  ;;  %v60_v29 = vrot.slane %v59_v17, 2  ;;  %v124_v42 = vrot.slane %v117_v31, %v953_v24 }
  0xa0   :  { %v126_v26 = vcombine.low %v52_v18, %v56_v15  ;;  %v97_v32 = vrot.slane %v90_v21, %v953_v24 }
  0xa1   :  { %v63_v27 = vpop.permute.xlu0 %62  ;;  %v67_v28 = vpop.permute.xlu1 %66 }
  0xa2   :  { %v64_v30 = vrot.slane %v63_v27, 2  ;;  %v99_v34 = vcombine.low %v59_v17, %v63_v27  ;;  %v68_v35 = vrot.slane %v67_v28, 2  ;;  %v133_v37 = vrot.slane %v126_v26, %v953_v24 }
  0xa3   :  { %v169_v43 = vcombine.low %v88_v36, %v97_v32  ;;  %v767_v44 = vcombine.high %v88_v36, %v97_v32 }
  0xa4   :  { %v135_v39 = vcombine.low %v60_v29, %v64_v30  ;;  %v106_v46 = vrot.slane %v99_v34, %v953_v24  ;;  %v186_v49 = vcombine.low %v124_v42, %v133_v37  ;;  %v769_v50 = vcombine.high %v124_v42, %v133_v37 }
  0xa5   :  { %v71_v38 = vpop.permute.xlu0 %70  ;;  %v177_v55 = vrot.slane %v169_v43, %v960_v45  ;;  %v211_v56 = vrot.slane %v767_v44, %v960_v45  ;;  %v280_v30 = vand.u32 127, %v85_v10 }
  0xa6   :  { %v72_v40 = vrot.slane %v71_v38, 2  ;;  %v108_v41 = vcombine.low %v67_v28, %v71_v38  ;;  %v142_v51 = vrot.slane %v135_v39, %v953_v24  ;;  %v194_v61 = vrot.slane %v186_v49, %v960_v45 }
  0xa7   :  { %v228_v62 = vrot.slane %v769_v50, %v960_v45  ;;  %v285_v31 = vadd.s32 4294967288, %v280_v30  ;;  %v283_v37 = vsub.s32 %v280_v30, %v950_v14 }
  0xa8   :  { %v115_v47 = vrot.slane %v108_v41, %v953_v24  ;;  %v144_v48 = vcombine.low %v68_v35, %v72_v40 }
  0xa9   :  { %v288_v34 = vsub.s32 %v285_v31, %v950_v14 }
  0xaa   :  { %v151_v52 = vrot.slane %v144_v48, %v953_v24  ;;  %v170_v53 = vcombine.low %v106_v46, %v115_v47  ;;  %v768_v54 = vcombine.high %v106_v46, %v115_v47 }
  0xac   :  { %v184_v57 = vrot.slane %v170_v53, %v960_v45  ;;  %v187_v58 = vcombine.low %v142_v51, %v151_v52  ;;  %v770_v59 = vcombine.high %v142_v51, %v151_v52  ;;  %v218_v60 = vrot.slane %v768_v54, %v960_v45 }
  0xad   :  { %v340_v51 = vstv %s773_s9  ;;  %v324_v52 = vstv %s771_s10 }
  0xae   :  { %v185_v63 = vcombine.low %v177_v55, %v184_v57  ;;  %v201_v1 = vrot.slane %v187_v58, %v960_v45  ;;  %v235_v2 = vrot.slane %v770_v59, %v960_v45  ;;  %v219_v3 = vcombine.low %v211_v56, %v218_v60 }
  0xaf   :  { %v332_v57 = vstv %s772_s11  ;;  %v348_v59 = vstv %s774_s12 }
  0xb0   :  { %v242_v4 = vsel %vm241_vm0, %v185_v63, 0.0  ;;  %v202_v5 = vcombine.low %v194_v61, %v201_v1  ;;  %v236_v6 = vcombine.low %v228_v62, %v235_v2  ;;  %v248_v9 = vsel %vm241_vm0, %v219_v3, 0.0 }
  0xb1   :  { %243 = vadd.xlane.f32.xlu1 %v242_v4  ;;  %v320_v61 = vstv %s319_s17  ;;  %v897_v62 = vmov 1966171168  }
  0xb2   :  { %v245_v7 = vsel %vm241_vm0, %v202_v5, 0.0  ;;  %v251_v8 = vsel %vm241_vm0, %v236_v6, 0.0  ;;  %v379_v63 = vunpack.c.l.s4 %v897_v62 }
  0xb3   :  { %246 = vadd.xlane.f32.xlu0 %v245_v7  ;;  %v259_v11 = vadd.f32 %v245_v7, %v242_v4  ;;  %v266_v12 = vadd.f32 %v251_v8, %v248_v9 }
  0xb4   :  { %v380_v4 = vunpack.c.0.s8 %v379_v63 }
  0xb5   :  { %v260_v13 = vrot.slane %v259_v11, 4  ;;  %252 = vadd.xlane.f32.xlu1 %v251_v8  ;;  %v267_v15 = vrot.slane %v266_v12, 4 }
  0xb6   :  { %v383_v8 = vsub.s32 %v380_v4, %v950_v14 }
  0xb7   :  { %v261_v16 = vadd.f32 %v260_v13, %v259_v11  ;;  %v268_v17 = vadd.f32 %v267_v15, %v266_v12  ;;  %249 = vadd.xlane.f32.xlu0 %v248_v9  ;;  %v357_v11 = vsub.s32 0, %v950_v14 }
  0xb9   :  { %v262_v18 = vrot.slane %v261_v16, 2  ;;  %v269_v19 = vrot.slane %v268_v17, 2 }
  0xbb   :  { %v263_v20 = vadd.f32 %v262_v18, %v261_v16  ;;  %v270_v21 = vadd.f32 %v269_v19, %v268_v17  ;;  %v368_v17 = vsub.s32 1, %v950_v14 }
  0xbd   :  { %v264_v22 = vrot.slane %v263_v20, 1  ;;  %v271_v23 = vrot.slane %v270_v21, 1 }
  0xbf   :  { %v265_v25 = vadd.f32 %v264_v22, %v263_v20  ;;  %v272_v26 = vadd.f32 %v271_v23, %v270_v21 }
  0xc1   :  { %v273_v27 = vmul.f32 0.0625, %v265_v25  ;;  %v274_v28 = vmul.f32 0.0625, %v272_v26 }
  0xc3   :  { %v307_v29 = vsel %vm306_vm1, %v274_v28, %v273_v27 }
 0x13e   :  { %v244_v32 = vpop.xlane.xlu1 %243 }
 0x13f   :  { %v255_v38 = vmul.f32 0.0625, %v244_v32 }
 0x140   :  { %v247_v33 = vpop.xlane.xlu0 %246 }
 0x141   :  { %v256_v35 = vmul.f32 0.0625, %v247_v33  ;;  %v284_v43 = vrot.slane %v255_v38, %v283_v37 }
 0x142   :  { %v253_v36 = vpop.xlane.xlu1 %252 }
 0x143   :  { %v258_v39 = vmul.f32 0.0625, %v253_v36  ;;  %v289_v41 = vrot.slane %v256_v35, %v288_v34 }
 0x144   :  { %v250_v40 = vpop.xlane.xlu0 %249 }
 0x145   :  { %v257_v42 = vmul.f32 0.0625, %v250_v40  ;;  %v299_v44 = vrot.slane %v258_v39, %v288_v34  ;;  %v291_v10 = vsel %vm290_vm2, %v289_v41, %v284_v43 }
 0x147   :  { %v295_v46 = vrot.slane %v257_v42, %v283_v37 }
 0x149   :  { %v300_v47 = vsel %vm290_vm2, %v299_v44, %v295_v46 }
 0x14a   :  { %v302_v48 = vsel %vm301_vm3, %v300_v47, %v291_v10 }
 0x14b   :  { %v310_v49 = vsel %vm309_vm4, %v302_v48, %v307_v29  ;;  %v898_v48 = vmov 0.0  }
 0x14c   :  { %312 = vrot.lane.b32.xlu0 %v310_v49, %s892_s8 }
 0x1be   :  { %v313_v50 = vpop.permute.xlu0 %312 }
 0x1bf   :  { %v316_v53 = vsel %vm315_vm5, 0.0, %v313_v50 }
 0x1c0   :  { %v318_v54 = vsel %vm317_vm6, %v316_v53, 0.0 }
 0x1c1   :  { %v341_v55 = vmul.f32 %v340_v51, %v318_v54  ;;  %v325_v56 = vmul.f32 %v324_v52, %v318_v54  ;;  %v333_v58 = vmul.f32 %v332_v57, %v318_v54  ;;  %v349_v60 = vmul.f32 %v348_v59, %v318_v54 }
 0x1c2   :  { %v321_v2 = vmul.f32 %v320_v61, %v318_v54 }
 0x1c3   :  { %343 = vrot.lane.b32.xlu0 %v341_v55, %s893_s13  ;;  %327 = vrot.lane.b32.xlu1 %v325_v56, %s894_s14 }
 0x1c7   :  { %335 = vrot.lane.b32.xlu1 %v333_v58, %s895_s15 }
 0x1cb   :  { %351 = vrot.lane.b32.xlu1 %v349_v60, %s896_s16 }
 0x235   :  { %v328_v1 = vpop.permute.xlu1 %327  ;;  %v344_v7 = vpop.permute.xlu0 %343 }
 0x236   :  { %v330_v3 = vadd.f32 %v328_v1, %v321_v2 }
 0x239   :  { %v336_v5 = vpop.permute.xlu1 %335 }
 0x23a   :  { %v338_v6 = vadd.f32 %v336_v5, %v330_v3 }
 0x23c   :  { %v346_v9 = vadd.f32 %v344_v7, %v338_v6 }
 0x23d   :  { %v352_v12 = vpop.permute.xlu1 %351 }
 0x23e   :  { %v354_v13 = vadd.f32 %v352_v12, %v346_v9 }
 0x240   :  { %v384_v15 = vrot.slane %v354_v13, %v383_v8  ;;  %v358_v16 = vrot.slane %v354_v13, %v357_v11  ;;  %v369_v20 = vrot.slane %v354_v13, %v368_v17 }
 0x242   :  { %364 = vbcast.lane.b32.xlu1 %v358_v16, 264  ;;  %360 = vbcast.lane.b32.xlu0 %v358_v16, 256  ;;  %v392_v18 = vrot.slane %v384_v15, %v383_v8  ;;  %v385_v19 = vcombine.high %v384_v15, %v384_v15 }
 0x244   :  { %v400_v21 = vcombine.high %v392_v18, %v392_v18  ;;  %v399_v22 = vrot.slane %v385_v19, %v383_v8 }
 0x246   :  { %375 = vbcast.lane.b32.xlu1 %v369_v20, 264  ;;  %371 = vbcast.lane.b32.xlu0 %v369_v20, 256  ;;  %v405_v23 = vrot.slane %v400_v21, %v357_v11  ;;  %v401_v25 = vcombine.high %v399_v22, %v399_v22 }
 0x248   :  { %v409_v26 = vrot.slane %v401_v25, %v357_v11 }
 0x2b4   :  { %v365_v27 = vpop.permute.xlu1 %364  ;;  %v361_v28 = vpop.permute.xlu0 %360 }
 0x2b5   :  { %v413_v29 = vmul.f32 %v405_v23, %v365_v27  ;;  %v412_v30 = vmul.f32 %v405_v23, %v361_v28 }
 0x2b7   :  { %v776_v31 = vmul.f32 -1.442695, %v413_v29  ;;  %v775_v32 = vmul.f32 -1.442695, %v412_v30 }
 0x2b8   :  { %v376_v33 = vpop.permute.xlu1 %375  ;;  %v372_v14 = vpop.permute.xlu0 %371 }
 0x2b9   :  { %805 = vpow2.f32 %v776_v31  ;;  %v415_v34 = vmul.f32 %v409_v26, %v376_v33  ;;  %v414_v35 = vmul.f32 %v409_v26, %v372_v14 }
 0x2ba   :  { %807 = vpow2.f32 %v775_v32 }
 0x2bb   :  { %v778_v36 = vmul.f32 -1.442695, %v415_v34  ;;  %v777_v37 = vmul.f32 -1.442695, %v414_v35 }
 0x2bd   :  { %809 = vpow2.f32 %v778_v36 }
 0x2be   :  { %811 = vpow2.f32 %v777_v37  ;;  %v780_v37 = vld.sshfl [vmem:[#allocation6 + $0x4] sm:$0x33 pattern:$0x76325410] }
 0x2c3   :  { %v806_v38 = vpop.eup %805 }
 0x2c4   :  { %v808_v39 = vpop.eup %807  ;;  %v429_v40 = vadd.f32 1.0, %v806_v38 }
 0x2c5   :  { %v428_v41 = vadd.f32 1.0, %v808_v39  ;;  %v655_v39 = vrot.slane %v939_v0, %v960_v45 }
 0x2c6   :  { %813 = vrcp.f32 %v429_v40  ;;  %v782_v40 = vld.sshfl [vmem:[#allocation6 + $0x8] sm:$0x33 pattern:$0x76325410] }
 0x2c7   :  { %v810_v42 = vpop.eup %809  ;;  %815 = vrcp.f32 %v428_v41 }
 0x2c8   :  { %v812_v43 = vpop.eup %811  ;;  %v431_v44 = vadd.f32 1.0, %v810_v42 }
 0x2c9   :  { %v430_v46 = vadd.f32 1.0, %v812_v43  ;;  %v784_v43 = vld.sshfl [vmem:[#allocation6 + $0xc] sm:$0x33 pattern:$0x76325410] }
 0x2ca   :  { %817 = vrcp.f32 %v431_v44 }
 0x2cb   :  { %819 = vrcp.f32 %v430_v46 }
 0x2d0   :  { %v814_v10 = vpop.eup %813 }
 0x2d1   :  { %v816_v47 = vpop.eup %815  ;;  %v506_v49 = vcombine.high %v814_v10, %v898_v48  ;;  %v513_v53 = vrot.slane %v814_v10, %v960_v45 }
 0x2d2   :  { %v440_v51 = vcombine.high %v816_v47, %v898_v48  ;;  %v447_v56 = vrot.slane %v816_v47, %v960_v45 }
 0x2d3   :  { %v520_v61 = vrot.slane %v506_v49, %v960_v45 }
 0x2d4   :  { %v818_v50 = vpop.eup %817  ;;  %v454_v2 = vrot.slane %v440_v51, %v960_v45 }
 0x2d5   :  { %v820_v52 = vpop.eup %819  ;;  %v528_v54 = vrot.slane %v818_v50, %v960_v45  ;;  %v521_v55 = vcombine.high %v818_v50, %v898_v48  ;;  %v682_v50 = vcombine.high %v780_v37, %v780_v37 }
 0x2d6   :  { %v462_v57 = vrot.slane %v820_v52, %v960_v45  ;;  %v455_v58 = vcombine.high %v820_v52, %v898_v48  ;;  %v656_v52 = vcombine.high %v655_v39, %v655_v39 }
 0x2d7   :  { %v537_v59 = vcombine.high %v513_v53, %v528_v54  ;;  %v536_v60 = vcombine.low %v513_v53, %v528_v54  ;;  %v535_v62 = vrot.slane %v521_v55, %v960_v45  ;;  %v708_v53 = vcombine.high %v782_v40, %v782_v40 }
 0x2d8   :  { %v471_v63 = vcombine.high %v447_v56, %v462_v57  ;;  %v470_v1 = vcombine.low %v447_v56, %v462_v57  ;;  %v469_v3 = vrot.slane %v455_v58, %v960_v45  ;;  %v734_v54 = vcombine.high %v784_v43, %v784_v43 }
 0x2d9   :  { %v551_v4 = vrot.slane %v537_v59, %v953_v24  ;;  %v544_v5 = vrot.slane %v536_v60, %v953_v24  ;;  %v552_v6 = vcombine.low %v520_v61, %v535_v62  ;;  %v553_v7 = vcombine.high %v520_v61, %v535_v62 }
 0x2da   :  { %v485_v8 = vrot.slane %v471_v63, %v953_v24  ;;  %v478_v9 = vrot.slane %v470_v1, %v953_v24  ;;  %v486_v11 = vcombine.low %v454_v2, %v469_v3  ;;  %v487_v12 = vcombine.high %v454_v2, %v469_v3 }
 0x2db   :  { %605 = vrot.lane.b32.xlu1 %v551_v4, %s888_s6  ;;  %v568_v13 = vcombine.high %v544_v5, %v898_v48  ;;  %v569_v16 = vcombine.high %v551_v4, %v898_v48  ;;  %v560_v18 = vrot.slane %v552_v6, %v953_v24  ;;  %v567_v20 = vrot.slane %v553_v7, %v953_v24 }
 0x2dc   :  { %577 = vrot.lane.b32.xlu0 %v485_v8, %s888_s6  ;;  %v502_v15 = vcombine.high %v478_v9, %v898_v48  ;;  %v503_v17 = vcombine.high %v485_v8, %v898_v48  ;;  %v494_v19 = vrot.slane %v486_v11, %v953_v24  ;;  %v501_v21 = vrot.slane %v487_v12, %v953_v24 }
 0x2dd   :  { %v570_v22 = vcombine.high %v560_v18, %v898_v48  ;;  %v571_v25 = vcombine.high %v567_v20, %v898_v48 }
 0x2de   :  { %v504_v23 = vcombine.high %v494_v19, %v898_v48  ;;  %v505_v26 = vcombine.high %v501_v21, %v898_v48 }
 0x2df   :  { %601 = vrot.lane.b32.xlu1 %v568_v13, %s889_s7 }
 0x2e0   :  { %573 = vrot.lane.b32.xlu0 %v502_v15, %s889_s7 }
 0x2e3   :  { %609 = vrot.lane.b32.xlu1 %v569_v16, %s887_s5 }
 0x2e4   :  { %581 = vrot.lane.b32.xlu0 %v503_v17, %s887_s5 }
 0x2e7   :  { %613 = vrot.lane.b32.xlu1 %v560_v18, %s886_s4 }
 0x2e8   :  { %585 = vrot.lane.b32.xlu0 %v494_v19, %s886_s4 }
 0x2eb   :  { %621 = vrot.lane.b32.xlu1 %v567_v20, %s885_s1 }
 0x2ec   :  { %593 = vrot.lane.b32.xlu0 %v501_v21, %s885_s1 }
 0x2ef   :  { %617 = vrot.lane.b32.xlu1 %v570_v22, %s884_s3 }
 0x2f0   :  { %589 = vrot.lane.b32.xlu0 %v504_v23, %s884_s3 }
 0x2f3   :  { %625 = vrot.lane.b32.xlu1 %v571_v25, %s883_s30 }
 0x2f4   :  { %597 = vrot.lane.b32.xlu0 %v505_v26, %s883_s30 }
 0x34d   :  { %v606_v27 = vpop.permute.xlu1 %605 }
 0x34e   :  { %v578_v28 = vpop.permute.xlu0 %577 }
 0x351   :  { %v602_v29 = vpop.permute.xlu1 %601 }
 0x352   :  { %v574_v24 = vpop.permute.xlu0 %573  ;;  %v641_v14 = vsel %vm241_vm0, %v544_v5, %v602_v29 }
 0x353   :  { %v628_v34 = vsel %vm241_vm0, %v478_v9, %v574_v24  ;;  %v642_v38 = vsel %vm629_vm7, %v641_v14, %v606_v27 }
 0x354   :  { %v630_v42 = vsel %vm629_vm7, %v628_v34, %v578_v28 }
 0x355   :  { %v610_v30 = vpop.permute.xlu1 %609 }
 0x356   :  { %v582_v31 = vpop.permute.xlu0 %581  ;;  %v643_v41 = vsel %vm631_vm8, %v642_v38, %v610_v30 }
 0x357   :  { %v632_v44 = vsel %vm631_vm8, %v630_v42, %v582_v31 }
 0x359   :  { %v614_v32 = vpop.permute.xlu1 %613 }
 0x35a   :  { %v586_v33 = vpop.permute.xlu0 %585  ;;  %v644_v46 = vsel %vm633_vm9, %v643_v41, %v614_v32 }
 0x35b   :  { %v634_v47 = vsel %vm633_vm9, %v632_v44, %v586_v33 }
 0x35d   :  { %v622_v35 = vpop.permute.xlu1 %621 }
 0x35e   :  { %v594_v36 = vpop.permute.xlu0 %593 }
 0x361   :  { %v618_v10 = vpop.permute.xlu1 %617 }
 0x362   :  { %v645_v48 = vsel %vm635_vm10, %v644_v46, %v618_v10  ;;  %v590_v49 = vpop.permute.xlu0 %589 }
 0x363   :  { %v636_v51 = vsel %vm635_vm10, %v634_v47, %v590_v49  ;;  %v646_v55 = vsel %vm637_vm11, %v645_v48, %v622_v35 }
 0x364   :  { %v638_v45 = vsel %vm637_vm11, %v636_v51, %v594_v36 }
 0x365   :  { %v626_v56 = vpop.permute.xlu1 %625 }
 0x366   :  { %v647_v0 = vsel %vm639_vm12, %v646_v55, %v626_v56  ;;  %v598_v57 = vpop.permute.xlu0 %597 }
 0x367   :  { %v660_v58 = vmul.f32 %v656_v52, %v647_v0  ;;  %v686_v59 = vmul.f32 %v682_v50, %v647_v0  ;;  %v712_v60 = vmul.f32 %v708_v53, %v647_v0  ;;  %v738_v61 = vmul.f32 %v734_v54, %v647_v0 }
 0x368   :  { %v640_v62 = vsel %vm639_vm12, %v638_v45, %v598_v57 }
 0x369   :  { %v659_v63 = vmul.f32 %v655_v39, %v640_v62  ;;  %v685_v1 = vmul.f32 %v780_v37, %v640_v62  ;;  %v711_v2 = vmul.f32 %v782_v40, %v640_v62  ;;  %v737_v3 = vmul.f32 %v784_v43, %v640_v62 }
 0x36b   :  { %v663_v4 = vcombine.low %v659_v63, %v660_v58  ;;  %v689_v5 = vcombine.low %v685_v1, %v686_v59  ;;  %v715_v6 = vcombine.low %v711_v2, %v712_v60  ;;  %v741_v7 = vcombine.low %v737_v3, %v738_v61 }
 0x36d   :  { %779 = vst.sshfl [vmem:[#allocation7] sm:$0x33 pattern:$0x76325410] %v663_v4 }
 0x36e   :  { %781 = vst.sshfl [vmem:[#allocation7 + $0x4] sm:$0x33 pattern:$0x76325410] %v689_v5 }
 0x36f   :  { %783 = vst.sshfl [vmem:[#allocation7 + $0x8] sm:$0x33 pattern:$0x76325410] %v715_v6 }
 0x370   :  { %785 = vst.sshfl [vmem:[#allocation7 + $0xc] sm:$0x33 pattern:$0x76325410] %v741_v7 }
 0x371   :  { %864 = shalt.err (!%p861_p1)
}
 0x372   :  { %s865_s23 = scalar_lea.hbm %s1032_s2, 256 }
 0x373   :  { %p866_p2 = scmp.ne.s32.totalorder %s1032_s2, %s865_s23  ;;  %p869_p3 = scmp.lt.u32.totalorder %s865_s23, %s1032_s2 }
 0x375   :  { %p871_p4 = pnand %p869_p3, %p866_p2 }
 0x377   :  { %874 = shalt.err (!%p871_p4)
}
 0x378   :  { %760 = dma.vmem_to_hbm [thread:$0]  %s758_s19, 256, %s1032_s2, [#allocation4]  }
 0x379   :  { %879 = dma.done.wait [#allocation4], 256  }
 0x37a   :  { %880 = vsyncadd [#allocation4], 4294967040 }
 0x37b   :  { %764 = vsyncpa [#allocation3], 1 }
 0x37c   :  { %765 = vsyncpa [#allocation4], 1 }
 0x37d   :  { %766 = vsyncpa [#allocation5], 1 }

</bundles_post_ra>
